<compile_context>
chip_gen: v7x
topology: tpu7x:2x2x1
jax: 0.10.0
libtpu: 0.0.40
codegen_flags: <defaults>
</compile_context>

<pallas_src>
import jax
import jax.numpy as jnp
from jax.experimental import pallas as pl
from jax.experimental.pallas import tpu as pltpu


_LANE = 128
_SUBLANE = 8


def _choose_row_tile(n, d, itemsize, t, cap=None):
    """Largest 8*2^k row tile whose working set fits a conservative VMEM budget."""
    budget = 16 * 1024 * 1024                         # target usage; limit set to 32 MiB
    fixed = t * _SUBLANE * d * 4 + _SUBLANE * _LANE * 4
    per_row = t * 2 * d * itemsize + 6 * d * 4        # double-buffered inputs + f32 temps
    budget_rows = max(_SUBLANE, (budget - fixed) // max(per_row, 1))
    limit = min(n, budget_rows)
    if cap is not None:
        limit = min(limit, cap)
    tile = _SUBLANE
    while tile * 2 <= limit:
        tile *= 2
    # Prefer a tile that divides N exactly (no partial-tile masking in the hot loop).
    for cand in (tile, tile // 2, tile // 4):
        if cand >= _SUBLANE and n % cand == 0:
            return cand
    return tile


def _make_kernel(t, n, d, row_tile, tiles_per_split, sep_attn_peak, needs_mask, use_mxu):
    """Specialized kernel; all arguments are static Python values."""

    def kernel(*refs):
        in_refs = refs[:t]
        if sep_attn_peak:
            rn_out_ref, pn_out_ref, rn_acc, prod_acc = refs[t:]
        else:
            rn_out_ref, rn_acc = refs[t:]
            pn_out_ref = prod_acc = None

        split = pl.program_id(0)
        r = pl.program_id(1)

        @pl.when(r == 0)
        def _init():
            rn_acc[...] = jnp.zeros_like(rn_acc)
            if sep_attn_peak:
                prod_acc[...] = jnp.ones_like(prod_acc)

        if needs_mask:
            global_tile = split * tiles_per_split + r
            n_valid = n - global_tile * row_tile          # >= row_tile except last tile
            row_ids = jax.lax.broadcasted_iota(jnp.int32, (row_tile, 1), 0)
            valid = row_ids < n_valid
        else:
            valid = None

        if use_mxu:
            ones_cols = jnp.ones((d, _LANE), jnp.float32)

        for ti in range(t):
            x = in_refs[ti][...].astype(jnp.float32)      # (row_tile, d)
            sq = x * x

            if use_mxu:
                # Route the D reduction through the otherwise-idle MXU.
                rq = jnp.dot(sq, ones_cols,
                             preferred_element_type=jnp.float32,
                             precision=jax.lax.Precision.HIGHEST)   # (row_tile, 128)
                rn = jnp.sqrt(rq)
                if needs_mask:
                    rn = jnp.where(valid, rn, 0.0)
                # Sublane-aligned fold (pure VALU adds); cross-sublane reduce deferred
                # to the wrapper.  Every lane carries the same value (ones matmul).
                rn_acc[...] += jnp.sum(
                    rn.reshape(row_tile // _SUBLANE, _SUBLANE, _LANE), axis=0)
            else:
                rq = jnp.sum(sq, axis=-1, keepdims=True)  # (row_tile, 1) lane reduce
                rn = jnp.sqrt(rq)
                if needs_mask:
                    rn = jnp.where(valid, rn, 0.0)
                rn_acc[...] += jnp.sum(rn, axis=0, keepdims=True)   # (1,1) broadcast add

            if sep_attn_peak:
                xp = jnp.where(valid, x, 1.0) if needs_mask else x
                p = xp
                rows = row_tile
                while rows > _SUBLANE:                    # exact power-of-two halvings
                    half = rows // 2
                    p = p[:half, :] * p[half:, :]
                    rows = half
                prod_acc[ti] = prod_acc[ti] * p           # (8, d) per-tensor partial prod

        @pl.when(r == tiles_per_split - 1)
        def _finalize():
            rn_out_ref[0] = rn_acc[...]
            if sep_attn_peak:
                pn_out_ref[0] = prod_acc[...]

    return kernel


def _fused_stats(tensors, sep_attn_peak, max_rows_per_tile=None):
    """tensors: list of T same-shape [N, D] arrays. Returns (row_norm_sum, prod_norm_sum)."""
    t = len(tensors)
    n, d = tensors[0].shape
    itemsize = tensors[0].dtype.itemsize

    row_tile = _choose_row_tile(n, d, itemsize, t, max_rows_per_tile)
    num_tiles = (n + row_tile - 1) // row_tile
    needs_mask = (n % row_tile) != 0
    # Leading "parallel" row-split axis: gives the 2nd TensorCore on v7x half the
    # tiles; on 1-TC v5e/v6e it just adds one extra tiny output block.
    n_splits = 2 if (num_tiles >= 2 and num_tiles % 2 == 0) else 1
    tiles_per_split = num_tiles // n_splits
    use_mxu = d <= 512

    kernel = _make_kernel(t, n, d, row_tile, tiles_per_split, sep_attn_peak,
                          needs_mask, use_mxu)

    def in_map(s, r):
        return (s * tiles_per_split + r, 0)

    in_specs = [pl.BlockSpec((row_tile, d), in_map) for _ in range(t)]

    rn_shape = jax.ShapeDtypeStruct((n_splits, _SUBLANE, _LANE), jnp.float32)
    rn_spec = pl.BlockSpec((1, _SUBLANE, _LANE), lambda s, r: (s, 0, 0))
    scratch = [pltpu.VMEM((_SUBLANE, _LANE), jnp.float32)]
    if sep_attn_peak:
        pn_shape = jax.ShapeDtypeStruct((n_splits, t, _SUBLANE, d), jnp.float32)
        pn_spec = pl.BlockSpec((1, t, _SUBLANE, d), lambda s, r: (s, 0, 0, 0))
        scratch.append(pltpu.VMEM((t, _SUBLANE, d), jnp.float32))
        out_shape = (rn_shape, pn_shape)
        out_specs = (rn_spec, pn_spec)
    else:
        out_shape = rn_shape
        out_specs = rn_spec

    flops = t * n * d * (260 if use_mxu else 3) + (t * n * d if sep_attn_peak else 0)
    transcendentals = t * n * (_LANE if use_mxu else 1)
    bytes_accessed = (t * n * d * itemsize
                      + n_splits * _SUBLANE * _LANE * 4
                      + (n_splits * t * _SUBLANE * d * 4 if sep_attn_peak else 0))

    grid_spec = pltpu.PrefetchScalarGridSpec(
        num_scalar_prefetch=0,
        grid=(n_splits, tiles_per_split),
        in_specs=in_specs,
        out_specs=out_specs,
        scratch_shapes=scratch,
    )

    outs = pl.pallas_call(
        kernel,
        out_shape=out_shape,
        grid_spec=grid_spec,
        compiler_params=pltpu.CompilerParams(
            dimension_semantics=("parallel", "arbitrary"),
            vmem_limit_bytes=32 * 1024 * 1024),
        cost_estimate=pl.CostEstimate(flops=int(flops),
                                      transcendentals=int(transcendentals),
                                      bytes_accessed=int(bytes_accessed)),
    )(*tensors)

    if sep_attn_peak:
        rn_out, pn_out = outs
    else:
        rn_out = outs

    # Tiny wrapper-side finalize on (n_splits, 8, 128) / (n_splits, T, 8, D) slabs.
    lane_factor = _LANE if use_mxu else (_SUBLANE * _LANE)
    overall = jnp.sum(rn_out) / jnp.float32(lane_factor)
    if not sep_attn_peak:
        return overall, None
    p = jnp.prod(pn_out, axis=(0, 2))                       # (T, D): over splits & sublanes
    sub = jnp.sum(jnp.sqrt(jnp.sum(p * p, axis=-1)))        # sum of per-tensor prod norms
    return overall, sub


class AttentionLoss:
    """JAX/Pallas port of the PyTorch AttentionLoss module (no learnable params)."""

    def __init__(self, sep_attn_peak: bool, max_rows_per_tile=None,
                 min_pallas_elems=64 * 1024):
        # config.getboolean('attention_loss', 'separate_attention_peak')
        self.sep_attn_peak = bool(sep_attn_peak)
        self.max_rows_per_tile = max_rows_per_tile
        self.min_pallas_elems = int(min_pallas_elems)

    def __call__(self, scores_list):
        # Group same-shape/dtype tensors; each group is reduced by one fused call
        # that reads the original tensors directly (no stacking copy).
        groups, order = {}, []
        for s in scores_list:
            key = (tuple(s.shape), str(s.dtype))
            if key not in groups:
                groups[key] = []
                order.append(key)
            groups[key].append(s)

        overall = jnp.float32(0.0)
        sub = jnp.float32(0.0)
        total_rows = 0
        for key in order:
            tensors = groups[key]
            n, d = key[0]
            total_rows += n * len(tensors)
            if n < _SUBLANE or n * d < self.min_pallas_elems:
                # Tiny tensors: kernel launch + pipeline warm-up cost more than a
                # fused jnp reduce; keep them on the plain XLA path.
                for x in tensors:
                    x32 = x.astype(jnp.float32)
                    overall = overall + jnp.sum(jnp.sqrt(jnp.sum(x32 * x32, axis=-1)))
                    if self.sep_attn_peak:
                        p = jnp.prod(x32, axis=0)
                        sub = sub + jnp.sqrt(jnp.sum(p * p))
            else:
                o, p = _fused_stats(tensors, self.sep_attn_peak, self.max_rows_per_tile)
                overall = overall + o
                if self.sep_attn_peak:
                    sub = sub + p

        loss1 = 1.0 - overall / jnp.float32(total_rows)
        if self.sep_attn_peak:
            loss2 = sub
            loss = loss1 + loss2
            return [loss, loss1, loss2]
        return [loss1]


def _reference(scores_list, sep_attn_peak):
    """Pure-JAX reference mirroring the PyTorch forward."""
    overall, sub, total = jnp.float32(0.0), jnp.float32(0.0), 0
    for s in scores_list:
        s32 = s.astype(jnp.float32)
        overall = overall + jnp.sum(jnp.sqrt(jnp.sum(s32 * s32, axis=-1)))
        total += s.shape[0]
        if sep_attn_peak:
            p = jnp.prod(s32, axis=0)
            sub = sub + jnp.sqrt(jnp.sum(p * p))
    loss1 = 1.0 - overall / jnp.float32(total)
    if sep_attn_peak:
        return [loss1 + sub, loss1, sub]
    return [loss1]


if __name__ == "__main__":
    key = jax.random.PRNGKey(0)
    ks = jax.random.split(key, 5)

    def mk(k, shape, dtype=jnp.float32):
        # Positive values near 1.0 so the per-tensor row product stays well scaled.
        return jnp.exp(0.02 * jax.random.normal(k, shape, jnp.float32)).astype(dtype)

    scores_list = [
        mk(ks[0], (64, 128)),              # group of two same-shape tensors (T = 2)
        mk(ks[1], (64, 128)),
        mk(ks[2], (100, 96)),              # partial last row tile (masked path)
        mk(ks[3], (104, 640)),             # wide D -> lane-reduce (non-MXU) path
        mk(ks[4], (8, 32), jnp.bfloat16),  # tiny tensor -> fused jnp fallback
    ]

    ok = True
    for sep in (True, False):
        refs = [jax.block_until_ready(r) for r in _reference(scores_list, sep)]
        for cap in (32, None):  # forced small tiles (multi-tile grid) and auto tiles
            loss_fn = AttentionLoss(sep_attn_peak=sep, max_rows_per_tile=cap,
                                    min_pallas_elems=1024)
            outs = [jax.block_until_ready(o) for o in loss_fn(scores_list)]
            for o, r in zip(outs, refs):
                if not bool(jnp.allclose(o, r, rtol=1e-4, atol=1e-4)):
                    ok = False

    print("KERNEL_OK" if ok else "KERNEL_MISMATCH")
</pallas_src>

<mosaic_0001>
module attributes {stable_mosaic.version = 11 : i64} {
  func.func @kernel(%arg0: i32, %arg1: i32, %arg2: memref<32x128xf32, #tpu.memory_space<vmem>>, %arg3: memref<32x128xf32, #tpu.memory_space<vmem>>, %arg4: memref<1x8x128xf32, #tpu.memory_space<vmem>>, %arg5: memref<1x2x8x128xf32, #tpu.memory_space<vmem>>, %arg6: memref<8x128xf32, #tpu.memory_space<vmem>>, %arg7: memref<2x8x128xf32, #tpu.memory_space<vmem>>) attributes {dimension_semantics = [#tpu.dimension_semantics<parallel>, #tpu.dimension_semantics<arbitrary>], iteration_bounds = array<i64: 2, 1>, scalar_prefetch = 0 : i64, scratch_operands = 2 : i64, tpu.core_type = #tpu.core_type<tc>, window_params = [{transform_indices = @transform_0, window_bounds = array<i64: 32, 128>}, {transform_indices = @transform_1, window_bounds = array<i64: 32, 128>}, {transform_indices = @transform_2, window_bounds = array<i64: 1, 8, 128>}, {transform_indices = @transform_3, window_bounds = array<i64: 1, 2, 8, 128>}]} {
    %c0_i32 = arith.constant 0 : i32
    %0 = arith.cmpi eq, %arg1, %c0_i32 : i32
    %1 = arith.extui %0 : i1 to i32
    %c0_i32_0 = arith.constant 0 : i32
    %2 = arith.cmpi ne, %1, %c0_i32_0 : i32
    scf.if %2 {
      %cst_29 = arith.constant 0.000000e+00 : f32
      %49 = vector.broadcast %cst_29 : f32 to vector<8x128xf32>
      %c0_30 = arith.constant 0 : index
      %c0_31 = arith.constant 0 : index
      %50 = vector.load %arg6[%c0_30, %c0_31] : memref<8x128xf32, #tpu.memory_space<vmem>>, vector<8x128xf32>
      tpu.vector_store %arg6[%c0_30, %c0_31], %49 {strides = array<i32>} : memref<8x128xf32, #tpu.memory_space<vmem>>, vector<8x128xf32>,
      %cst_32 = arith.constant 1.000000e+00 : f32
      %51 = vector.broadcast %cst_32 : f32 to vector<2x8x128xf32>
      %c0_33 = arith.constant 0 : index
      %c0_34 = arith.constant 0 : index
      %c0_35 = arith.constant 0 : index
      %52 = vector.load %arg7[%c0_33, %c0_34, %c0_35] : memref<2x8x128xf32, #tpu.memory_space<vmem>>, vector<2x8x128xf32>
      tpu.vector_store %arg7[%c0_33, %c0_34, %c0_35], %51 {strides = array<i32>} : memref<2x8x128xf32, #tpu.memory_space<vmem>>, vector<2x8x128xf32>,
    } else {
    }
    %cst = arith.constant 1.000000e+00 : f32
    %3 = vector.broadcast %cst : f32 to vector<128x128xf32>
    %c0 = arith.constant 0 : index
    %c0_1 = arith.constant 0 : index
    %4 = vector.load %arg2[%c0, %c0_1] : memref<32x128xf32, #tpu.memory_space<vmem>>, vector<32x128xf32>
    %5 = arith.mulf %4, %4 : vector<32x128xf32>
    %cst_2 = arith.constant dense<0.000000e+00> : vector<32x128xf32>
    %6 = tpu.matmul %5, %3, %cst_2 {dimension_numbers = #tpu.dot_dimension_numbers<[1], [0], [0], [1], [0, 0, 1, 1], [], []>, precision = #tpu.contract_precision<fp32>} : vector<32x128xf32>, vector<128x128xf32>, vector<32x128xf32> -> vector<32x128xf32>
    %7 = math.sqrt %6 : vector<32x128xf32>
    %c0_3 = arith.constant 0 : index
    %c0_4 = arith.constant 0 : index
    %8 = vector.load %arg6[%c0_3, %c0_4] : memref<8x128xf32, #tpu.memory_space<vmem>>, vector<8x128xf32>
    %9 = vector.shape_cast %7 : vector<32x128xf32> to vector<4x8x128xf32>
    %cst_5 = arith.constant dense<0.000000e+00> : vector<8x128xf32>
    %10 = vector.multi_reduction <add>, %9, %cst_5 [0] : vector<4x8x128xf32> to vector<8x128xf32>
    %11 = arith.addf %8, %10 : vector<8x128xf32>
    %c0_6 = arith.constant 0 : index
    %c0_7 = arith.constant 0 : index
    %12 = vector.load %arg6[%c0_6, %c0_7] : memref<8x128xf32, #tpu.memory_space<vmem>>, vector<8x128xf32>
    tpu.vector_store %arg6[%c0_6, %c0_7], %11 {strides = array<i32>} : memref<8x128xf32, #tpu.memory_space<vmem>>, vector<8x128xf32>,
    %13 = vector.extract_strided_slice %4 {offsets = [0, 0], sizes = [16, 128], strides = [1, 1]} : vector<32x128xf32> to vector<16x128xf32>
    %14 = vector.extract_strided_slice %4 {offsets = [16, 0], sizes = [16, 128], strides = [1, 1]} : vector<32x128xf32> to vector<16x128xf32>
    %15 = arith.mulf %13, %14 : vector<16x128xf32>
    %16 = vector.extract_strided_slice %15 {offsets = [0, 0], sizes = [8, 128], strides = [1, 1]} : vector<16x128xf32> to vector<8x128xf32>
    %17 = vector.extract_strided_slice %15 {offsets = [8, 0], sizes = [8, 128], strides = [1, 1]} : vector<16x128xf32> to vector<8x128xf32>
    %18 = arith.mulf %16, %17 : vector<8x128xf32>
    %c0_8 = arith.constant 0 : index
    %c0_9 = arith.constant 0 : index
    %c0_10 = arith.constant 0 : index
    %19 = vector.load %arg7[%c0_8, %c0_9, %c0_10] : memref<2x8x128xf32, #tpu.memory_space<vmem>>, vector<1x8x128xf32>
    %20 = vector.shape_cast %19 : vector<1x8x128xf32> to vector<8x128xf32>
    %21 = arith.mulf %20, %18 : vector<8x128xf32>
    %c0_11 = arith.constant 0 : index
    %c0_12 = arith.constant 0 : index
    %c0_13 = arith.constant 0 : index
    %22 = vector.load %arg7[%c0_11, %c0_12, %c0_13] : memref<2x8x128xf32, #tpu.memory_space<vmem>>, vector<1x8x128xf32>
    %23 = vector.shape_cast %22 : vector<1x8x128xf32> to vector<8x128xf32>
    %24 = vector.shape_cast %21 : vector<8x128xf32> to vector<1x8x128xf32>
    tpu.vector_store %arg7[%c0_11, %c0_12, %c0_13], %24 {strides = array<i32>} : memref<2x8x128xf32, #tpu.memory_space<vmem>>, vector<1x8x128xf32>,
    %c0_14 = arith.constant 0 : index
    %c0_15 = arith.constant 0 : index
    %25 = vector.load %arg3[%c0_14, %c0_15] : memref<32x128xf32, #tpu.memory_space<vmem>>, vector<32x128xf32>
    %26 = arith.mulf %25, %25 : vector<32x128xf32>
    %cst_16 = arith.constant dense<0.000000e+00> : vector<32x128xf32>
    %27 = tpu.matmul %26, %3, %cst_16 {dimension_numbers = #tpu.dot_dimension_numbers<[1], [0], [0], [1], [0, 0, 1, 1], [], []>, precision = #tpu.contract_precision<fp32>} : vector<32x128xf32>, vector<128x128xf32>, vector<32x128xf32> -> vector<32x128xf32>
    %28 = math.sqrt %27 : vector<32x128xf32>
    %c0_17 = arith.constant 0 : index
    %c0_18 = arith.constant 0 : index
    %29 = vector.load %arg6[%c0_17, %c0_18] : memref<8x128xf32, #tpu.memory_space<vmem>>, vector<8x128xf32>
    %30 = vector.shape_cast %28 : vector<32x128xf32> to vector<4x8x128xf32>
    %cst_19 = arith.constant dense<0.000000e+00> : vector<8x128xf32>
    %31 = vector.multi_reduction <add>, %30, %cst_19 [0] : vector<4x8x128xf32> to vector<8x128xf32>
    %32 = arith.addf %29, %31 : vector<8x128xf32>
    %c0_20 = arith.constant 0 : index
    %c0_21 = arith.constant 0 : index
    %33 = vector.load %arg6[%c0_20, %c0_21] : memref<8x128xf32, #tpu.memory_space<vmem>>, vector<8x128xf32>
    tpu.vector_store %arg6[%c0_20, %c0_21], %32 {strides = array<i32>} : memref<8x128xf32, #tpu.memory_space<vmem>>, vector<8x128xf32>,
    %34 = vector.extract_strided_slice %25 {offsets = [0, 0], sizes = [16, 128], strides = [1, 1]} : vector<32x128xf32> to vector<16x128xf32>
    %35 = vector.extract_strided_slice %25 {offsets = [16, 0], sizes = [16, 128], strides = [1, 1]} : vector<32x128xf32> to vector<16x128xf32>
    %36 = arith.mulf %34, %35 : vector<16x128xf32>
    %37 = vector.extract_strided_slice %36 {offsets = [0, 0], sizes = [8, 128], strides = [1, 1]} : vector<16x128xf32> to vector<8x128xf32>
    %38 = vector.extract_strided_slice %36 {offsets = [8, 0], sizes = [8, 128], strides = [1, 1]} : vector<16x128xf32> to vector<8x128xf32>
    %39 = arith.mulf %37, %38 : vector<8x128xf32>
    %c1 = arith.constant 1 : index
    %c0_22 = arith.constant 0 : index
    %c0_23 = arith.constant 0 : index
    %40 = vector.load %arg7[%c1, %c0_22, %c0_23] : memref<2x8x128xf32, #tpu.memory_space<vmem>>, vector<1x8x128xf32>
    %41 = vector.shape_cast %40 : vector<1x8x128xf32> to vector<8x128xf32>
    %42 = arith.mulf %41, %39 : vector<8x128xf32>
    %c1_24 = arith.constant 1 : index
    %c0_25 = arith.constant 0 : index
    %c0_26 = arith.constant 0 : index
    %43 = vector.load %arg7[%c1_24, %c0_25, %c0_26] : memref<2x8x128xf32, #tpu.memory_space<vmem>>, vector<1x8x128xf32>
    %44 = vector.shape_cast %43 : vector<1x8x128xf32> to vector<8x128xf32>
    %45 = vector.shape_cast %42 : vector<8x128xf32> to vector<1x8x128xf32>
    tpu.vector_store %arg7[%c1_24, %c0_25, %c0_26], %45 {strides = array<i32>} : memref<2x8x128xf32, #tpu.memory_space<vmem>>, vector<1x8x128xf32>,
    %c0_i32_27 = arith.constant 0 : i32
    %46 = arith.cmpi eq, %arg1, %c0_i32_27 : i32
    %47 = arith.extui %46 : i1 to i32
    %c0_i32_28 = arith.constant 0 : i32
    %48 = arith.cmpi ne, %47, %c0_i32_28 : i32
    scf.if %48 {
      %c0_29 = arith.constant 0 : index
      %c0_30 = arith.constant 0 : index
      %49 = vector.load %arg6[%c0_29, %c0_30] : memref<8x128xf32, #tpu.memory_space<vmem>>, vector<8x128xf32>
      %c0_31 = arith.constant 0 : index
      %c0_32 = arith.constant 0 : index
      %c0_33 = arith.constant 0 : index
      %50 = vector.load %arg4[%c0_31, %c0_32, %c0_33] : memref<1x8x128xf32, #tpu.memory_space<vmem>>, vector<1x8x128xf32>
      %51 = vector.shape_cast %50 : vector<1x8x128xf32> to vector<8x128xf32>
      %52 = vector.shape_cast %49 : vector<8x128xf32> to vector<1x8x128xf32>
      tpu.vector_store %arg4[%c0_31, %c0_32, %c0_33], %52 {strides = array<i32>} : memref<1x8x128xf32, #tpu.memory_space<vmem>>, vector<1x8x128xf32>,
      %c0_34 = arith.constant 0 : index
      %c0_35 = arith.constant 0 : index
      %c0_36 = arith.constant 0 : index
      %53 = vector.load %arg7[%c0_34, %c0_35, %c0_36] : memref<2x8x128xf32, #tpu.memory_space<vmem>>, vector<2x8x128xf32>
      %c0_37 = arith.constant 0 : index
      %c0_38 = arith.constant 0 : index
      %c0_39 = arith.constant 0 : index
      %c0_40 = arith.constant 0 : index
      %54 = vector.load %arg5[%c0_37, %c0_38, %c0_39, %c0_40] : memref<1x2x8x128xf32, #tpu.memory_space<vmem>>, vector<1x2x8x128xf32>
      %55 = vector.shape_cast %54 : vector<1x2x8x128xf32> to vector<2x8x128xf32>
      %56 = vector.shape_cast %53 : vector<2x8x128xf32> to vector<1x2x8x128xf32>
      tpu.vector_store %arg5[%c0_37, %c0_38, %c0_39, %c0_40], %56 {strides = array<i32>} : memref<1x2x8x128xf32, #tpu.memory_space<vmem>>, vector<1x2x8x128xf32>,
    } else {
    }
    return
  }
  func.func @transform_0(%arg0: i32, %arg1: i32) -> (i32, i32) {
    %c1_i32 = arith.constant 1 : i32
    %0 = arith.muli %arg0, %c1_i32 : i32
    %1 = arith.addi %0, %arg1 : i32
    %c0_i32 = arith.constant 0 : i32
    %c0_i32_0 = arith.constant 0 : i32
    return %1, %c0_i32 : i32, i32
  }
  func.func @transform_1(%arg0: i32, %arg1: i32) -> (i32, i32) {
    %c1_i32 = arith.constant 1 : i32
    %0 = arith.muli %arg0, %c1_i32 : i32
    %1 = arith.addi %0, %arg1 : i32
    %c0_i32 = arith.constant 0 : i32
    %c0_i32_0 = arith.constant 0 : i32
    return %1, %c0_i32 : i32, i32
  }
  func.func @transform_2(%arg0: i32, %arg1: i32) -> (i32, i32, i32) {
    %c0_i32 = arith.constant 0 : i32
    %c0_i32_0 = arith.constant 0 : i32
    %c0_i32_1 = arith.constant 0 : i32
    return %arg0, %c0_i32, %c0_i32_0 : i32, i32, i32
  }
  func.func @transform_3(%arg0: i32, %arg1: i32) -> (i32, i32, i32, i32) {
    %c0_i32 = arith.constant 0 : i32
    %c0_i32_0 = arith.constant 0 : i32
    %c0_i32_1 = arith.constant 0 : i32
    %c0_i32_2 = arith.constant 0 : i32
    return %arg0, %c0_i32, %c0_i32_0, %c0_i32_1 : i32, i32, i32, i32
  }
}

</mosaic_0001>

<bundles_post_ra>
// kernel: tpu_custom_call.1
= control target key start
LH: loop header
LB: loop body
LE: loop exit
PB: predicated region body
PF: predicated region fallthrough
CT: control target
= control target key end

     0   :  { %9 = vsyncpa [#allocation5], 0  ;;  %s3087_s0 = inlined_call_operand.hbm [shape: f32[64,128], index: 0, kind: input, shape index: {}]   ;;  %s3088_s1 = inlined_call_operand.hbm [shape: f32[64,128], index: 1, kind: input, shape index: {}]   ;;  %s3089_s2 = inlined_call_operand.hbm [shape: f32[2,8,128], index: 2, kind: output, shape index: {0}]   ;;  %s3090_s3 = inlined_call_operand.hbm [shape: f32[2,2,8,128], index: 3, kind: output, shape index: {1}]  }
   0x1   :  { %11 = vsyncpa [#allocation5 + $0x1], 0 }
   0x2   :  { %12 = vsyncpa [#allocation8], 0 }
   0x3   :  { %14 = vsyncpa [#allocation8 + $0x1], 0 }
   0x4   :  { %15 = vsyncpa [#allocation6], 0 }
   0x5   :  { %17 = vsyncpa [#allocation6 + $0x1], 0 }
   0x6   :  { %18 = vsyncpa [#allocation11], 0 }
   0x7   :  { %20 = vsyncpa [#allocation11 + $0x1], 0  ;;  %s2560_s12 = smov 0   ;;  %s2562_s13 = smov 0  }
   0x8   :  { %s2564_s14 = smov 0   ;;  %s2566_s15 = smov 0  }
   0x9   :  { %s2568_s16 = smov 0   ;;  %s2570_s17 = smov 0  }
   0xa LB: > { %s1669_s18 = sadd.s32 4294967295, %s2528_s17   ;;  %s1670_s19 = sadd.s32 4294967294, %s2528_s17   ;;  %s2528_s17 = sphi %s2570_s17, %s26_s17   ;;  %s2524_s16 = sphi %s2568_s16, %s3108_s16   ;;  %s2520_s15 = sphi %s2566_s15, %s3107_s15   ;;  %s2516_s14 = sphi %s2564_s14, %s3106_s14   ;;  %s2512_s13 = sphi %s2562_s13, %s3105_s13   ;;  %s2508_s12 = sphi %s2560_s12, %s3104_s12  }
   0xb   : > { %s38_s20 = sadd.s32 1, %s2524_s16  ;;  %s47_s21 = sadd.s32 1, %s2516_s14 }
   0xc   : > { %p40_p0 = scmp.ge.s32.totalorder %s38_s20, 2  ;;  %p54_p1 = scmp.ne.s32.totalorder %s2516_s14, %s2512_s13 }
   0xd   : > { %p55_p2 = scmp.eq.s32.totalorder %s2528_s17, 0  ;;  %p60_p3 = scmp.ne.s32.totalorder %s2512_s13, %s2508_s12 }
   0xe   : > { %s3110_s20 = smov (%p40_p0, %s38_s20), 0  ;;  %p61_p5 = scmp.eq.s32.totalorder %s1669_s18, 0 }
   0xf   : > { %p2601_p4 = por %p55_p2, %p54_p1  ;;  %s44_s23 = ssub.s32 %s2524_s16, %s3110_s20 }
  0x10   : > { %p112_p6 = scmp.eq.s32.totalorder %s1669_s18, 1  ;;  %p45_p7 = scmp.eq.s32.totalorder %s44_s23, 0 }
  0x11   : > { %p2607_p8 = por %p61_p5, %p60_p3  ;;  %p118_p10 = scmp.eq.s32.totalorder %s1670_s19, 1 }
  0x12   : > { %p2611_p9 = por %p112_p6, %p54_p1  ;;  %p2278_p13 = scmp.lt.s32.totalorder %s2528_s17, 2 }
  0x13   : > { %s3094_s24 = scalar_select %p2607_p8, 1, 0 }
  0x14   : > { %s3095_s25 = scalar_select %p2611_p9, 1, 0 }
  0x15   : > { %s2616_s26 = scalar_select %p45_p7, %s2516_s14, %s47_s21  }
  0x16   : > { %p2618_p11 = por %p118_p10, %p60_p3  ;;  %s2625_s28 = sand.u32 1, %s2516_s14  }
  0x17   : > { %s1673_s29 = sshll.u32 %s2625_s28, 5  ;;  %s1691_s30 = sshll.u32 %s2524_s16, 9 }
  0x18   : > { %s3096_s27 = scalar_select %p2618_p11, 1, 0 }
  0x19   : > { %s2634_s6 = scalar_lea.hbm %s3087_s0, %s1691_s30  ;;  %s168_s7 = scalar_lea.vmem [#allocation4], %s1673_s29 }
  0x1a   : > { %s176_s8 = sshll.u32 %s168_s7, 4  ;;  %p2642_p0 = pnand %p2278_p13, %p2601_p4  ;;  %s2638_s8 = int_to_ptr.vmem [resolvable:$true] %s176_s8 }
  0x1b   : > { %s165_s10 = scalar_lea.sflag [#allocation5], %s2625_s28  ;;  %s2350_s11 = scalar_lea.hbm %s2634_s6, 512 }
  0x1c   : > { %p2351_p2 = scmp.ne.s32.totalorder %s2634_s6, %s2350_s11  ;;  %p2352_p3 = pneg %p2642_p0 }
  0x1d   : > { %s2355_s21 = scalar_lea.hbm %s3087_s0, 1024  ;;  %p2356_p4 = scmp.lt.u32.totalorder %s2634_s6, %s3087_s0 }
  0x1e   : > { %p2353_p5 = pnand %p2352_p3, %p2351_p2  ;;  %p2357_p7 = scmp.lt.u32.totalorder %s2355_s21, %s2350_s11 }
  0x1f   : > { %p2359_p13 = scmp.lt.u32.totalorder %s2350_s11, %s2634_s6 }
  0x20   : > { %p2354_p6 = pneg %p2353_p5  ;;  %p2358_p10 = por %p2357_p7, %p2356_p4 }
  0x22   : > { %p2360_p12 = por %p2359_p13, %p2358_p10 }
  0x24   : > { %p2361_p1 = pnand %p2360_p12, %p2354_p6 }
  0x26   : > { %2364 = shalt.err (!%p2361_p1)
}
  0x27   : > { %s2365_s4 = scalar_lea.vmem %s2638_s8, 512  ;;  %s2530_s5 = smov [#allocation4]  }
  0x28   : > { %p2366_p2 = scmp.ne.s32.totalorder %s2638_s8, %s2365_s4  ;;  %s2370_s7 = sshll.u32 %s2530_s5, 4  ;;  %s2371_s7 = int_to_ptr.vmem [resolvable:$false] %s2370_s7 }
  0x29   : > { %s2372_s18 = scalar_lea.vmem %s2371_s7, 1024  ;;  %p2373_p9 = scmp.lt.s32.totalorder %s2638_s8, %s2371_s7 }
  0x2a   : > { %p2368_p5 = pnand %p2366_p2, %p2352_p3  ;;  %p2374_p4 = scmp.lt.s32.totalorder %s2372_s18, %s2365_s4 }
  0x2c   : > { %p2369_p11 = pneg %p2368_p5  ;;  %p2375_p7 = por %p2374_p4, %p2373_p9 }
  0x2e   : > { %p2376_p10 = pnand %p2375_p7, %p2369_p11 }
  0x30   : > { %2379 = shalt.err (!%p2376_p10)
}
  0x31   : > { %s2531_s11 = smov 128   ;;  %s2532_s19 = smov 8  }
  0x32   : > { %2267 = dma.hbm_to_vmem [thread:$0]  (!%p2642_p0), %s2634_s6, 512, %s2638_s8, %s165_s10, %s2531_s11, %s2531_s11, %s2532_s19  }
  0x33   : > { %p206_p9 = scmp.lt.s32.totalorder %s2528_s17, 3  ;;  %s2684_s23 = scalar_lea.hbm %s3088_s1, %s1691_s30 }
  0x34   : > { %p3098_p11 = scmp.ge.s32.totalorder %s2528_s17, 1  ;;  %s190_s5 = scalar_lea.vmem [#allocation7], %s1673_s29 }
  0x35   : > { %s198_s7 = sshll.u32 %s190_s5, 4  ;;  %s187_s6 = scalar_lea.sflag [#allocation8], %s2625_s28  ;;  %s2694_s7 = int_to_ptr.vmem [resolvable:$true] %s198_s7 }
  0x36   : > { %p2688_p12 = pnand %p3098_p11, %p206_p9  ;;  %s2380_s8 = scalar_lea.hbm %s2684_s23, 512 }
  0x37   : > { %p2381_p1 = scmp.ne.s32.totalorder %s2684_s23, %s2380_s8  ;;  %s2385_s18 = scalar_lea.hbm %s3088_s1, 1024 }
  0x38   : > { %p2386_p2 = scmp.lt.u32.totalorder %s2684_s23, %s3088_s1  ;;  %p2387_p5 = scmp.lt.u32.totalorder %s2385_s18, %s2380_s8 }
  0x39   : > { %p2383_p6 = pnand %p2381_p1, %p2352_p3  ;;  %p2389_p7 = scmp.lt.u32.totalorder %s2380_s8, %s2684_s23 }
  0x3a   : > { %p2388_p4 = por %p2387_p5, %p2386_p2 }
  0x3b   : > { %p2384_p13 = pneg %p2383_p6 }
  0x3c   : > { %p2390_p10 = por %p2389_p7, %p2388_p4 }
  0x3e   : > { %p2391_p9 = pnand %p2390_p10, %p2384_p13 }
  0x40   : > { %2394 = shalt.err (!%p2391_p9)
}
  0x41   : > { %s2395_s29 = scalar_lea.vmem %s2694_s7, 512  ;;  %s2533_s5 = smov [#allocation7]  }
  0x42   : > { %p2396_p11 = scmp.ne.s32.totalorder %s2694_s7, %s2395_s29  ;;  %s2400_s30 = sshll.u32 %s2533_s5, 4  ;;  %s2401_s30 = int_to_ptr.vmem [resolvable:$false] %s2400_s30 }
  0x43   : > { %s2402_s10 = scalar_lea.vmem %s2401_s30, 1024  ;;  %p2403_p8 = scmp.lt.s32.totalorder %s2694_s7, %s2401_s30 }
  0x44   : > { %p2398_p1 = pnand %p2396_p11, %p2352_p3  ;;  %p2404_p2 = scmp.lt.s32.totalorder %s2402_s10, %s2395_s29 }
  0x46   : > { %p2399_p6 = pneg %p2398_p1  ;;  %p2405_p5 = por %p2404_p2, %p2403_p8 }
  0x48   : > { %p2406_p4 = pnand %p2405_p5, %p2399_p6 }
  0x4a   : > { %2409 = shalt.err (!%p2406_p4)
}
  0x4b   : > { %2270 = dma.hbm_to_vmem [thread:$0]  (!%p2642_p0), %s2684_s23, 512, %s2694_s7, %s187_s6, %s2531_s11, %s2531_s11, %s2532_s19  }
  0x4c   : > { %210 = sbr.rel (%p2688_p12) target bundleno = 461 (0x1cd), region = 28  ;;  %s2728_s8 = sand.u32 (!%p2688_p12), 1, %s2512_s13  }
  0x4d   : > { %s1680_s18 = sshll.u32 (!%p2688_p12), %s2728_s8, 5  ;;  %s213_s21 = scalar_lea.sflag (!%p2688_p12), [#allocation5], %s2728_s8 }
  0x4e   : > { %s216_s9 = scalar_lea.vmem (!%p2688_p12), [#allocation4], %s1680_s18  ;;  %p3100_p8 = scmp.ne.s32.totalorder (!%p2688_p12), %s3094_s24, 0 }
  0x53   : > { %2491 = dma.done.wait (%p3100_p8), %s213_s21, 512  }
  0x54   : > { %2493 = vsyncadd (%p3100_p8), %s213_s21, 4294966784  ;;  %s222_s28 = scalar_lea.sflag [#allocation8], %s2728_s8  ;;  %s225_s11 = scalar_lea.vmem [#allocation7], %s1680_s18 }
  0x55   : > { %2495 = dma.done.wait (%p3100_p8), %s222_s28, 512  }
  0x56   : > { %2497 = vsyncadd (%p3100_p8), %s222_s28, 4294966784  ;;  %v2534_v0 = vmov 1.0|1.0   ;;  %v269_v1 = vld [vmem:[%s216_s9] sm:$0xff]  ;;  %v270_v2 = vld [vmem:[%s216_s9 + $0x8] sm:$0xff]  ;;  %v2535_v59 = vmov 0.0  }
  0x57   : > { %2120 = vmatprep.subr.bf16.mxu0 %v2534_v0  ;;  %2168 = vmatprep.subr.bf16.mxu1 %v2534_v0  ;;  %v271_v3 = vld [vmem:[%s216_s9 + $0x10] sm:$0xff]  ;;  %v272_v4 = vld [vmem:[%s216_s9 + $0x18] sm:$0xff]  ;;  %v273_v5 = vmul.f32 %v269_v1, %v269_v1  ;;  %v879_v7 = vld [vmem:[%s225_s11] sm:$0xff]  ;;  %v274_v9 = vmul.f32 %v270_v2, %v270_v2  ;;  %s1683_s24 = sshll.u32 %s2728_s8, 4  ;;  %s1693_s23 = sshll.u32 %s2520_s15, 8 }
  0x58   : > { %2121 = vmatpush3.bf16.msra.mxu0 %v2534_v0  ;;  %2169 = vmatpush3.bf16.msra.mxu1 %v2534_v0  ;;  %v873_v6 = vmul.f32 %v271_v3, %v269_v1  ;;  %v880_v8 = vld [vmem:[%s225_s11 + $0x8] sm:$0xff]  ;;  %v874_v10 = vmul.f32 %v272_v4, %v270_v2  ;;  %v881_v11 = vld [vmem:[%s225_s11 + $0x10] sm:$0xff]  ;;  %v882_v12 = vld [vmem:[%s225_s11 + $0x18] sm:$0xff]  ;;  %v883_v13 = vmul.f32 %v879_v7, %v879_v7  ;;  %s257_s19 = scalar_lea.vmem [#allocation10], %s1683_s24  ;;  %s2980_s22 = scalar_lea.hbm %s3090_s3, %s1693_s23 }
  0x59   : > { %2122 = vmatprep.subr.bf16.mxu0 %v2534_v0  ;;  %2170 = vmatprep.subr.bf16.mxu1 %v2534_v0  ;;  %v884_v14 = vmul.f32 %v880_v8, %v880_v8  ;;  %v2753_v15 = vand.u32 4294901760, %v273_v5  ;;  %v1483_v16 = vmul.f32 %v881_v11, %v879_v7  ;;  %v1484_v17 = vmul.f32 %v882_v12, %v880_v8  ;;  %s1531_s4 = sshll.u32 %s257_s19, 4  ;;  %s1505_s29 = scalar_lea.sflag [#allocation11], %s2728_s8  ;;  %s2982_s4 = int_to_ptr.vmem [resolvable:$true] %s1531_s4 }
  0x5a   : > { %v2757_v18 = vmul.f32 %v874_v10, %v873_v6  ;;  %v2759_v19 = vand.u32 4294901760, %v883_v13  ;;  %v275_v20 = vmul.f32 %v271_v3, %v271_v3  ;;  %v2766_v23 = vand.u32 4294901760, %v274_v9  ;;  %s2410_s5 = scalar_lea.vmem %s2982_s4, 256  ;;  %p3101_p3 = scmp.ne.s32.totalorder %s3095_s25, 0 }
  0x5b   : > { %v2762_v21 = vsub.f32 %v273_v5, %v2753_v15  ;;  %v2764_v22 = vmul.f32 %v1484_v17, %v1483_v16  ;;  %v885_v24 = vmul.f32 %v881_v11, %v881_v11  ;;  %v2771_v26 = vand.u32 4294901760, %v884_v14  ;;  %p2411_p0 = scmp.ne.s32.totalorder %s2982_s4, %s2410_s5  ;;  %s2536_s30 = smov [#allocation10]  }
  0x5c   : > { %2123 = vmatpush3.bf16.msra.mxu0 %v2534_v0  ;;  %2171 = vmatpush3.bf16.msra.mxu1 %v2534_v0  ;;  %v2769_v25 = vsub.f32 %v883_v13, %v2759_v19  ;;  %v276_v27 = vmul.f32 %v272_v4, %v272_v4  ;;  %v886_v29 = vmul.f32 %v882_v12, %v882_v12  ;;  %v2779_v31 = vand.u32 4294901760, %v275_v20  ;;  %s2414_s10 = sshll.u32 %s2536_s30, 4  ;;  %s2415_s10 = int_to_ptr.vmem [resolvable:$false] %s2414_s10 }
  0x5d   : > { %2124 = vmatprep.subr.bf16.mxu0 %v2534_v0  ;;  %2172 = vmatprep.subr.bf16.mxu1 %v2534_v0  ;;  %v344_v28 = vand.u32 4294901760, %v2762_v21  ;;  %v2781_v32 = vand.u32 4294901760, %v885_v24  ;;  %v2787_v34 = vsub.f32 %v274_v9, %v2766_v23  ;;  %v2793_v36 = vsub.f32 %v884_v14, %v2771_v26  ;;  %1497 = vst [vmem:[%s257_s19] sm:$0xff] %v2757_v18  ;;  %p2412_p12 = pnand %p2411_p0, %p3101_p3  ;;  %s2416_s18 = scalar_lea.vmem %s2415_s10, 512 }
  0x5e   : > { %v954_v30 = vand.u32 4294901760, %v2769_v25  ;;  %v2795_v37 = vand.u32 4294901760, %v276_v27  ;;  %v2797_v38 = vand.u32 4294901760, %v886_v29  ;;  %v2804_v41 = vsub.f32 %v275_v20, %v2779_v31  ;;  %1498 = vst [vmem:[%s257_s19 + $0x8] sm:$0xff] %v2764_v22  ;;  %p2417_p7 = scmp.lt.s32.totalorder %s2982_s4, %s2415_s10  ;;  %p2418_p10 = scmp.lt.s32.totalorder %s2416_s18, %s2410_s5 }
  0x5f   : > { %v345_v33 = vsub.f32 %v2762_v21, %v344_v28  ;;  %v2807_v42 = vsub.f32 %v885_v24, %v2781_v32  ;;  %v354_v43 = vand.u32 4294901760, %v2787_v34  ;;  %v964_v44 = vand.u32 4294901760, %v2793_v36  ;;  %p2413_p13 = pneg %p2412_p12 }
  0x60   : > { %2125 = vmatpush3.bf16.msra.mxu0 %v2534_v0  ;;  %2173 = vmatpush3.bf16.msra.mxu1 %v2534_v0  ;;  %v955_v35 = vsub.f32 %v2769_v25, %v954_v30  ;;  %v2812_v45 = vsub.f32 %v276_v27, %v2795_v37  ;;  %v2815_v46 = vsub.f32 %v886_v29, %v2797_v38  ;;  %v364_v47 = vand.u32 4294901760, %v2804_v41  ;;  %p2419_p9 = por %p2418_p10, %p2417_p7 }
  0x61   : > { %2126 = vmatprep.subr.bf16.mxu0 %v2534_v0  ;;  %2174 = vmatprep.subr.bf16.mxu1 %v2534_v0  ;;  %v346_v39 = vand.u32 4294901760, %v345_v33  ;;  %v974_v48 = vand.u32 4294901760, %v2807_v42  ;;  %v355_v49 = vsub.f32 %v2787_v34, %v354_v43  ;;  %v965_v50 = vsub.f32 %v2793_v36, %v964_v44 }
  0x62   : > { %v956_v40 = vand.u32 4294901760, %v955_v35  ;;  %v374_v51 = vand.u32 4294901760, %v2812_v45  ;;  %v984_v52 = vand.u32 4294901760, %v2815_v46  ;;  %v365_v53 = vsub.f32 %v2804_v41, %v364_v47  ;;  %p2420_p11 = pnand %p2419_p9, %p2413_p13 }
  0x63   : > { %1876 = vmatprep.mubr.f32.mxu0 %v346_v39  ;;  %v975_v54 = vsub.f32 %v2807_v42, %v974_v48  ;;  %v356_v55 = vand.u32 4294901760, %v355_v49  ;;  %v966_v56 = vand.u32 4294901760, %v965_v50 }
  0x64   : > { %2127 = vmatpush3.bf16.msra.mxu0 %v2534_v0  ;;  %2175 = vmatpush3.bf16.msra.mxu1 %v2534_v0  ;;  %v375_v57 = vsub.f32 %v2812_v45, %v374_v51  ;;  %v985_v58 = vsub.f32 %v2815_v46, %v984_v52  ;;  %v366_v60 = vand.u32 4294901760, %v365_v53 }
  0x65   : > { %2128 = vmatprep.subr.bf16.mxu0 %v2534_v0  ;;  %2176 = vmatprep.subr.bf16.mxu1 %v2534_v0  ;;  %v976_v61 = vand.u32 4294901760, %v975_v54 }
  0x66   : > { %2014 = vmatprep.mubr.f32.mxu1 %v956_v40  ;;  %v376_v62 = vand.u32 4294901760, %v375_v57  ;;  %v986_v63 = vand.u32 4294901760, %v985_v58 }
  0x68   : > { %2129 = vmatpush3.bf16.msra.mxu0 %v2534_v0  ;;  %2177 = vmatpush3.bf16.msra.mxu1 %v2534_v0 }
  0x69   : > { %2130 = vmatprep.subr.bf16.mxu0 %v2534_v0  ;;  %2178 = vmatprep.subr.bf16.mxu1 %v2534_v0 }
  0x6c   : > { %2131 = vmatpush3.bf16.msra.mxu0 %v2534_v0  ;;  %2179 = vmatpush3.bf16.msra.mxu1 %v2534_v0 }
  0x6d   : > { %2132 = vmatprep.subr.bf16.mxu0 %v2534_v0  ;;  %2180 = vmatprep.subr.bf16.mxu1 %v2534_v0 }
  0x70   : > { %2133 = vmatpush3.bf16.msra.mxu0 %v2534_v0  ;;  %2181 = vmatpush3.bf16.msra.mxu1 %v2534_v0 }
  0x71   : > { %2134 = vmatprep.subr.bf16.mxu0 %v2534_v0  ;;  %2182 = vmatprep.subr.bf16.mxu1 %v2534_v0 }
  0x74   : > { %2135 = vmatpush3.bf16.msra.mxu0 %v2534_v0  ;;  %2183 = vmatpush3.bf16.msra.mxu1 %v2534_v0 }
  0x75   : > { %1882 = vmatprep.subr.mxu0 %v2535_v59  ;;  %2020 = vmatprep.subr.mxu1 %v2535_v59 }
  0x77   : > { %1877 = vmatmul.mubr.f32.vlgmr.msra.gmra.mrb[0].mxu0 %v356_v55  ;;  %2015 = vmatmul.mubr.f32.vlgmr.msra.gmra.mrb[0].mxu1 %v966_v56 }
  0x78   : > { %1883 = vmatpush3.msra.mxu0 %v2535_v59  ;;  %2021 = vmatpush3.msra.mxu1 %v2535_v59 }
  0x79   : > { %1879 = vmatprep.mubr.f32.mxu0 %v366_v60  ;;  %2017 = vmatprep.mubr.f32.mxu1 %v976_v61 }
  0x7a   : > { %1890 = vmatprep.subr.mxu0 %v2535_v59  ;;  %2028 = vmatprep.subr.mxu1 %v2535_v59 }
  0x7b   : > { %1880 = vmatmul.mubr.f32.gmra.mrb[2].mxu0 %v376_v62  ;;  %2018 = vmatmul.mubr.f32.gmra.mrb[2].mxu1 %v986_v63 }
  0x7c   : > { %1884 = vmatprep.mubr.f32.mxu0 %v2753_v15  ;;  %2022 = vmatprep.mubr.f32.mxu1 %v2759_v19 }
  0x7f   : > { %1885 = vmatmul.mubr.f32.vlgmr.msra.gmra.mrb[0].mxu0 %v2766_v23  ;;  %2023 = vmatmul.mubr.f32.vlgmr.msra.gmra.mrb[0].mxu1 %v2771_v26 }
  0x80   : > { %1891 = vmatpush3.msra.mxu0 %v2535_v59  ;;  %2029 = vmatpush3.msra.mxu1 %v2535_v59 }
  0x81   : > { %1887 = vmatprep.mubr.f32.mxu0 %v2779_v31  ;;  %2025 = vmatprep.mubr.f32.mxu1 %v2781_v32 }
  0x82   : > { %2136 = vmatprep.subr.bf16.mxu0 %v2534_v0  ;;  %2184 = vmatprep.subr.bf16.mxu1 %v2534_v0 }
  0x83   : > { %1888 = vmatmul.mubr.f32.gmra.mrb[2].mxu0 %v2795_v37  ;;  %2026 = vmatmul.mubr.f32.gmra.mrb[2].mxu1 %v2797_v38 }
  0x84   : > { %1892 = vmatprep.mubr.f32.mxu0 %v2762_v21  ;;  %2030 = vmatprep.mubr.f32.mxu1 %v2769_v25 }
  0x87   : > { %1893 = vmatmul.mubr.f32.vlgmr.msra.gmra.mrb[0].mxu0 %v2787_v34  ;;  %2031 = vmatmul.mubr.f32.vlgmr.msra.gmra.mrb[0].mxu1 %v2793_v36 }
  0x88   : > { %2137 = vmatpush3.bf16.msra.mxu0 %v2534_v0  ;;  %2185 = vmatpush3.bf16.msra.mxu1 %v2534_v0 }
  0x89   : > { %2138 = vmatprep.subr.bf16.mxu0 %v2534_v0  ;;  %2186 = vmatprep.subr.bf16.mxu1 %v2534_v0 }
  0x8a   : > { %1895 = vmatprep.mubr.f32.mxu0 %v2804_v41  ;;  %2033 = vmatprep.mubr.f32.mxu1 %v2807_v42 }
  0x8b   : > { %1896 = vmatmul.mubr.f32.gmra.mrb[2].mxu0 %v2812_v45  ;;  %2034 = vmatmul.mubr.f32.gmra.mrb[2].mxu1 %v2815_v46 }
  0x8c   : > { %2139 = vmatpush3.bf16.msra.mxu0 %v2534_v0  ;;  %2187 = vmatpush3.bf16.msra.mxu1 %v2534_v0 }
  0x8d   : > { %2140 = vmatprep.subr.bf16.mxu0 %v2534_v0  ;;  %2188 = vmatprep.subr.bf16.mxu1 %v2534_v0 }
  0x8e   : > { %1930 = vmatprep.mubr.f32.mxu0 %v344_v28  ;;  %2068 = vmatprep.mubr.f32.mxu1 %v954_v30 }
  0x90   : > { %2141 = vmatpush3.bf16.msra.mxu0 %v2534_v0  ;;  %2189 = vmatpush3.bf16.msra.mxu1 %v2534_v0 }
  0x91   : > { %2142 = vmatprep.subr.bf16.mxu0 %v2534_v0  ;;  %2190 = vmatprep.subr.bf16.mxu1 %v2534_v0 }
  0x94   : > { %2143 = vmatpush3.bf16.msra.mxu0 %v2534_v0  ;;  %2191 = vmatpush3.bf16.msra.mxu1 %v2534_v0 }
  0x95   : > { %2144 = vmatprep.subr.bf16.mxu0 %v2534_v0  ;;  %2192 = vmatprep.subr.bf16.mxu1 %v2534_v0 }
  0x98   : > { %2145 = vmatpush3.bf16.msra.mxu0 %v2534_v0  ;;  %2193 = vmatpush3.bf16.msra.mxu1 %v2534_v0 }
  0x99   : > { %2146 = vmatprep.subr.bf16.mxu0 %v2534_v0  ;;  %2194 = vmatprep.subr.bf16.mxu1 %v2534_v0 }
  0x9c   : > { %2147 = vmatpush3.bf16.msra.mxu0 %v2534_v0  ;;  %2195 = vmatpush3.bf16.msra.mxu1 %v2534_v0 }
  0x9d   : > { %2148 = vmatprep.subr.bf16.mxu0 %v2534_v0  ;;  %2196 = vmatprep.subr.bf16.mxu1 %v2534_v0 }
  0xa0   : > { %2149 = vmatpush3.bf16.msra.mxu0 %v2534_v0  ;;  %2197 = vmatpush3.bf16.msra.mxu1 %v2534_v0 }
  0xa1   : > { %2150 = vmatprep.subr.bf16.mxu0 %v2534_v0  ;;  %2198 = vmatprep.subr.bf16.mxu1 %v2534_v0 }
  0xa4   : > { %2151 = vmatpush3.bf16.msra.mxu0 %v2534_v0  ;;  %2199 = vmatpush3.bf16.msra.mxu1 %v2534_v0 }
  0xa5   : > { %1936 = vmatprep.subr.mxu0 %v2535_v59  ;;  %2074 = vmatprep.subr.mxu1 %v2535_v59 }
  0xa7   : > { %1931 = vmatmul.mubr.f32.vlgmr.msra.gmra.mrb[0].mxu0 %v354_v43  ;;  %2069 = vmatmul.mubr.f32.vlgmr.msra.gmra.mrb[0].mxu1 %v964_v44 }
  0xa8   : > { %1937 = vmatpush3.msra.mxu0 %v2535_v59  ;;  %2075 = vmatpush3.msra.mxu1 %v2535_v59 }
  0xa9   : > { %1933 = vmatprep.mubr.f32.mxu0 %v364_v47  ;;  %2071 = vmatprep.mubr.f32.mxu1 %v974_v48 }
  0xaa   : > { %2152 = vmatprep.subr.bf16.mxu0 %v2534_v0  ;;  %2200 = vmatprep.subr.bf16.mxu1 %v2534_v0 }
  0xab   : > { %1934 = vmatmul.mubr.f32.gmra.mrb[2].mxu0 %v374_v51  ;;  %2072 = vmatmul.mubr.f32.gmra.mrb[2].mxu1 %v984_v52 }
  0xac   : > { %1938 = vmatprep.mubr.f32.mxu0 %v2753_v15  ;;  %2076 = vmatprep.mubr.f32.mxu1 %v2759_v19 }
  0xaf   : > { %1939 = vmatmul.mubr.f32.vlgmr.msra.gmra.mrb[0].mxu0 %v2766_v23  ;;  %2077 = vmatmul.mubr.f32.vlgmr.msra.gmra.mrb[0].mxu1 %v2771_v26 }
  0xb0   : > { %2153 = vmatpush3.bf16.msra.mxu0 %v2534_v0  ;;  %2201 = vmatpush3.bf16.msra.mxu1 %v2534_v0 }
  0xb1   : > { %2154 = vmatprep.subr.bf16.mxu0 %v2534_v0  ;;  %2202 = vmatprep.subr.bf16.mxu1 %v2534_v0 }
  0xb2   : > { %1941 = vmatprep.mubr.f32.mxu0 %v2779_v31  ;;  %2079 = vmatprep.mubr.f32.mxu1 %v2781_v32 }
  0xb3   : > { %1942 = vmatmul.mubr.f32.gmra.mrb[2].mxu0 %v2795_v37  ;;  %2080 = vmatmul.mubr.f32.gmra.mrb[2].mxu1 %v2797_v38 }
  0xb4   : > { %2155 = vmatpush3.bf16.msra.mxu0 %v2534_v0  ;;  %2203 = vmatpush3.bf16.msra.mxu1 %v2534_v0 }
  0xb5   : > { %2156 = vmatprep.subr.bf16.mxu0 %v2534_v0  ;;  %2204 = vmatprep.subr.bf16.mxu1 %v2534_v0 }
  0xb6   : > { %1976 = vmatprep.mubr.f32.mxu0 %v2753_v15  ;;  %2114 = vmatprep.mubr.f32.mxu1 %v2759_v19 }
  0xb8   : > { %2157 = vmatpush3.bf16.msra.mxu0 %v2534_v0  ;;  %2205 = vmatpush3.bf16.msra.mxu1 %v2534_v0 }
  0xb9   : > { %2158 = vmatprep.subr.bf16.mxu0 %v2534_v0  ;;  %2206 = vmatprep.subr.bf16.mxu1 %v2534_v0 }
  0xbc   : > { %2159 = vmatpush3.bf16.msra.mxu0 %v2534_v0  ;;  %2207 = vmatpush3.bf16.msra.mxu1 %v2534_v0 }
  0xbd   : > { %2160 = vmatprep.subr.bf16.mxu0 %v2534_v0  ;;  %2208 = vmatprep.subr.bf16.mxu1 %v2534_v0 }
  0xc0   : > { %2161 = vmatpush3.bf16.msra.mxu0 %v2534_v0  ;;  %2209 = vmatpush3.bf16.msra.mxu1 %v2534_v0 }
  0xc1   : > { %2162 = vmatprep.subr.bf16.mxu0 %v2534_v0  ;;  %2210 = vmatprep.subr.bf16.mxu1 %v2534_v0 }
  0xc4   : > { %2163 = vmatpush3.bf16.msra.mxu0 %v2534_v0  ;;  %2211 = vmatpush3.bf16.msra.mxu1 %v2534_v0 }
  0xc5   : > { %2164 = vmatprep.subr.bf16.mxu0 %v2534_v0  ;;  %2212 = vmatprep.subr.bf16.mxu1 %v2534_v0 }
  0xc8   : > { %2165 = vmatpush3.bf16.msra.mxu0 %v2534_v0  ;;  %2213 = vmatpush3.bf16.msra.mxu1 %v2534_v0 }
  0xc9   : > { %2166 = vmatprep.subr.bf16.mxu0 %v2534_v0  ;;  %2214 = vmatprep.subr.bf16.mxu1 %v2534_v0 }
  0xcc   : > { %2167 = vmatpush3.bf16.msra.mxu0 %v2534_v0  ;;  %2215 = vmatpush3.bf16.msra.mxu1 %v2534_v0 }
  0xcf   : > { %1977 = vmatmul.mubr.f32.vlgmr.msra.gmra.mrb[0].mxu0 %v2766_v23  ;;  %2115 = vmatmul.mubr.f32.vlgmr.msra.gmra.mrb[0].mxu1 %v2771_v26 }
  0xd0   : > { %1979 = vmatprep.mubr.f32.mxu0 %v2779_v31  ;;  %2117 = vmatprep.mubr.f32.mxu1 %v2781_v32 }
  0xd3   : > { %1980 = vmatmul.mubr.f32.gmra.mrb[2].mxu0 %v2795_v37  ;;  %2118 = vmatmul.mubr.f32.gmra.mrb[2].mxu1 %v2797_v38 }
  0xd4   : > { %2423 = shalt.err (!%p2420_p11)
}
  0xd5   : > { %s2424_s21 = scalar_lea.hbm %s2980_s22, 256  ;;  %s2428_s11 = scalar_lea.hbm %s3090_s3, 512 }
  0xd6   : > { %p2425_p1 = scmp.ne.s32.totalorder %s2980_s22, %s2424_s21  ;;  %p2429_p5 = scmp.lt.u32.totalorder %s2980_s22, %s3090_s3 }
  0xd7   : > { %p2430_p4 = scmp.lt.u32.totalorder %s2428_s11, %s2424_s21  ;;  %p2432_p0 = scmp.lt.u32.totalorder %s2424_s21, %s2980_s22 }
  0xd8   : > { %p2426_p6 = pnand %p2425_p1, %p3101_p3 }
  0xd9   : > { %p2431_p8 = por %p2430_p4, %p2429_p5 }
  0xda   : > { %p2427_p2 = pneg %p2426_p6 }
  0xdb   : > { %p2433_p12 = por %p2432_p0, %p2431_p8 }
  0xdd   : > { %p2434_p13 = pnand %p2433_p12, %p2427_p2 }
  0xdf   : > { %2437 = shalt.err (!%p2434_p13)
}
  0xe0   : > { %s2537_s23 = smov 128   ;;  %s2538_s7 = smov 8  }
  0xe1   : > { %2261 = dma.vmem_to_hbm [thread:$0]  (%p3101_p3), %s2982_s4, 256, %s2980_s22, %s1505_s29, %s2537_s23, %s2537_s23, %s2538_s7  }
  0xe2   : > { %s1682_s4 = sshll.u32 %s2728_s8, 3  ;;  %s1686_s6 = sshll.u32 %s2520_s15, 7 }
  0xe3   : > { %s250_s22 = scalar_lea.vmem [#allocation9], %s1682_s4  ;;  %s3038_s10 = scalar_lea.hbm %s3089_s2, %s1686_s6 }
  0xe4   : > { %s1518_s29 = sshll.u32 %s250_s22, 4  ;;  %s1500_s18 = scalar_lea.sflag [#allocation6], %s2728_s8  ;;  %s3040_s29 = int_to_ptr.vmem [resolvable:$true] %s1518_s29 }
  0xe5   : > { %s2438_s21 = scalar_lea.vmem %s3040_s29, 128  ;;  %s2539_s15 = smov [#allocation9]  }
  0xe6   : > { %p2439_p7 = scmp.ne.s32.totalorder %s3040_s29, %s2438_s21  ;;  %s2442_s9 = sshll.u32 %s2539_s15, 4  ;;  %s2443_s9 = int_to_ptr.vmem [resolvable:$false] %s2442_s9 }
  0xe7   : > { %s2444_s28 = scalar_lea.vmem %s2443_s9, 256  ;;  %p2445_p11 = scmp.lt.s32.totalorder %s3040_s29, %s2443_s9 }
  0xe8   : > { %p2440_p10 = pnand %p2439_p7, %p3101_p3  ;;  %p2446_p1 = scmp.lt.s32.totalorder %s2444_s28, %s2438_s21 }
  0xea   : > { %p2441_p9 = pneg %p2440_p10  ;;  %p2447_p6 = por %p2446_p1, %p2445_p11 }
  0xec   : > { %p2448_p2 = pnand %p2447_p6, %p2441_p9 }
 0x1a2   : > { %v1978_v0 = vpop.f32.mrb[0].mxu0  ;;  %v2116_v1 = vpop.f32.mrb[0].mxu1 }
 0x1a3   : > { %2334 = vrsqrt.f32 %v1978_v0  ;;  %v817_v2 = vpop.f32.mrb[1].mxu0  ;;  %v1427_v3 = vpop.f32.mrb[1].mxu1  ;;  %vm848_vm0 = vcmp.eq.f32.partialorder %v1978_v0, inf  ;;  %vm850_vm1 = vcmp.eq.f32.partialorder %v1978_v0, 0.0  ;;  %v851_v9 = vand.u32 2147483648, %v1978_v0 }
 0x1a4   : > { %2336 = vrsqrt.f32 %v2116_v1  ;;  %vm1458_vm2 = vcmp.eq.f32.partialorder %v2116_v1, inf  ;;  %vm1460_vm3 = vcmp.eq.f32.partialorder %v2116_v1, 0.0  ;;  %v1461_v12 = vand.u32 2147483648, %v2116_v1 }
 0x1a5   : > { %2338 = vrsqrt.f32 %v817_v2  ;;  %vm841_vm4 = vcmp.eq.f32.partialorder %v817_v2, inf  ;;  %vm843_vm5 = vcmp.eq.f32.partialorder %v817_v2, 0.0  ;;  %v844_v15 = vand.u32 2147483648, %v817_v2 }
 0x1a6   : > { %2340 = vrsqrt.f32 %v1427_v3  ;;  %v3008_v4 = vpop.f32.mrb[2].mxu0  ;;  %v3010_v5 = vpop.f32.mrb[2].mxu1  ;;  %vm1451_vm6 = vcmp.eq.f32.partialorder %v1427_v3, inf  ;;  %vm1453_vm7 = vcmp.eq.f32.partialorder %v1427_v3, 0.0  ;;  %v1454_v19 = vand.u32 2147483648, %v1427_v3 }
 0x1a7   : > { %2342 = vrsqrt.f32 %v3008_v4  ;;  %v829_v6 = vpop.f32.mrb[3].mxu0  ;;  %v1439_v7 = vpop.f32.mrb[3].mxu1  ;;  %vm862_vm8 = vcmp.eq.f32.partialorder %v3008_v4, inf  ;;  %v865_v28 = vand.u32 2147483648, %v3008_v4  ;;  %vm1472_vm9 = vcmp.eq.f32.partialorder %v3010_v5, inf }
 0x1a8   : > { %2344 = vrsqrt.f32 %v3010_v5  ;;  %vm855_vm10 = vcmp.eq.f32.partialorder %v829_v6, inf  ;;  %vm857_vm11 = vcmp.eq.f32.partialorder %v829_v6, 0.0  ;;  %v858_v37 = vand.u32 2147483648, %v829_v6 }
 0x1a9   : > { %2346 = vrsqrt.f32 %v829_v6  ;;  %vm1465_vm12 = vcmp.eq.f32.partialorder %v1439_v7, inf  ;;  %v1468_v42 = vand.u32 2147483648, %v1439_v7  ;;  %vm1467_vm13 = vcmp.eq.f32.partialorder %v1439_v7, 0.0 }
 0x1aa   : > { %2348 = vrsqrt.f32 %v1439_v7  ;;  %vm864_vm14 = vcmp.eq.f32.partialorder %v3008_v4, 0.0  ;;  %v1475_v46 = vand.u32 2147483648, %v3010_v5  ;;  %vm1474_vm15 = vcmp.eq.f32.partialorder %v3010_v5, 0.0 }
 0x1ad   : > { %v2335_v8 = vpop.eup %2334 }
 0x1ae   : > { %v2337_v10 = vpop.eup %2336  ;;  %v847_v11 = vmul.f32 %v2335_v8, %v1978_v0 }
 0x1af   : > { %v2339_v13 = vpop.eup %2338  ;;  %v1457_v14 = vmul.f32 %v2337_v10, %v2116_v1 }
 0x1b0   : > { %v2341_v16 = vpop.eup %2340  ;;  %v849_v17 = vsel %vm848_vm0, %v1978_v0, %v847_v11  ;;  %v840_v18 = vmul.f32 %v2339_v13, %v817_v2 }
 0x1b1   : > { %v2343_v20 = vpop.eup %2342  ;;  %v852_v21 = vsel %vm850_vm1, %v851_v9, %v849_v17  ;;  %v1459_v22 = vsel %vm1458_vm2, %v2116_v1, %v1457_v14  ;;  %v1450_v23 = vmul.f32 %v2341_v16, %v1427_v3 }
 0x1b2   : > { %v2345_v24 = vpop.eup %2344  ;;  %v1462_v25 = vsel %vm1460_vm3, %v1461_v12, %v1459_v22  ;;  %v842_v26 = vsel %vm841_vm4, %v817_v2, %v840_v18  ;;  %v861_v27 = vmul.f32 %v2343_v20, %v3008_v4 }
 0x1b3   : > { %v2347_v29 = vpop.eup %2346  ;;  %v845_v30 = vsel %vm843_vm5, %v844_v15, %v842_v26  ;;  %v1452_v31 = vsel %vm1451_vm6, %v1427_v3, %v1450_v23  ;;  %v1471_v32 = vmul.f32 %v2345_v24, %v3010_v5 }
 0x1b4   : > { %v2349_v33 = vpop.eup %2348  ;;  %v1455_v34 = vsel %vm1453_vm7, %v1454_v19, %v1452_v31  ;;  %v854_v35 = vmul.f32 %v2347_v29, %v829_v6  ;;  %v868_v36 = vadd.f32 %v852_v21, %v845_v30  ;;  %v863_v40 = vsel %vm862_vm8, %v3008_v4, %v861_v27 }
 0x1b5   : > { %v1464_v38 = vmul.f32 %v2349_v33, %v1439_v7  ;;  %v1478_v39 = vadd.f32 %v1462_v25, %v1455_v34  ;;  %v1473_v43 = vsel %vm1472_vm9, %v3010_v5, %v1471_v32  ;;  %v866_v50 = vsel %vm864_vm14, %v865_v28, %v863_v40 }
 0x1b6   : > { %v856_v41 = vsel %vm855_vm10, %v829_v6, %v854_v35  ;;  %v1476_v52 = vsel %vm1474_vm15, %v1475_v46, %v1473_v43 }
 0x1b7   : > { %v859_v44 = vsel %vm857_vm11, %v858_v37, %v856_v41  ;;  %v1466_v45 = vsel %vm1465_vm12, %v1439_v7, %v1464_v38 }
 0x1b8   : > { %v869_v47 = vadd.f32 %v868_v36, %v859_v44  ;;  %v1469_v48 = vsel %vm1467_vm13, %v1468_v42, %v1466_v45 }
 0x1b9   : > { %v1479_v49 = vadd.f32 %v1478_v39, %v1469_v48 }
 0x1ba   : > { %v870_v51 = vadd.f32 %v869_v47, %v866_v50 }
 0x1bb   : > { %v1480_v53 = vadd.f32 %v1479_v49, %v1476_v52 }
 0x1bd   : > { %v1481_v54 = vadd.f32 %v1480_v53, %v870_v51 }
 0x1bf   : > { %1494 = vst [vmem:[%s250_s22] sm:$0xff] %v1481_v54 }
 0x1c0   : > { %2451 = shalt.err (!%p2448_p2)
}
 0x1c1   : > { %s2452_s8 = scalar_lea.hbm %s3038_s10, 128  ;;  %s2456_s19 = scalar_lea.hbm %s3089_s2, 256 }
 0x1c2   : > { %p2453_p5 = scmp.ne.s32.totalorder %s3038_s10, %s2452_s8  ;;  %p2457_p0 = scmp.lt.u32.totalorder %s3038_s10, %s3089_s2 }
 0x1c3   : > { %p2458_p12 = scmp.lt.u32.totalorder %s2456_s19, %s2452_s8  ;;  %p2460_p7 = scmp.lt.u32.totalorder %s2452_s8, %s3038_s10 }
 0x1c4   : > { %p2454_p4 = pnand %p2453_p5, %p3101_p3 }
 0x1c5   : > { %p2459_p13 = por %p2458_p12, %p2457_p0 }
 0x1c6   : > { %p2455_p8 = pneg %p2454_p4 }
 0x1c7   : > { %p2461_p10 = por %p2460_p7, %p2459_p13 }
 0x1c9   : > { %p2462_p9 = pnand %p2461_p10, %p2455_p8 }
 0x1cb   : > { %2465 = shalt.err (!%p2462_p9)
}
 0x1cc   : > { %2260 = dma.vmem_to_hbm [thread:$0]  (%p3101_p3), %s3040_s29, 128, %s3038_s10, %s1500_s18  }
 0x1cd PF: > { %s1546_s4 = sand.u32 1, %s2508_s12   ;;  %p3102_p11 = scmp.ne.s32.totalorder %s3096_s27, 0 }
 0x1ce   : > { %p3103_p1 = scmp.ge.s32.totalorder %s2528_s17, 2  ;;  %s1547_s6 = scalar_lea.sflag [#allocation6], %s1546_s4 }
 0x1d0   : > { %p2272_p6 = pnand %p3103_p1, %p3102_p11 }
 0x1d2   : > { %2499 = dma.done.wait (!%p2272_p6), %s1547_s6, 128  }
 0x1d3   : > { %2501 = vsyncadd (!%p2272_p6), %s1547_s6, 4294967168  ;;  %s1556_s22 = scalar_lea.sflag [#allocation11], %s1546_s4 }
 0x1d4   : > { %2503 = dma.done.wait (!%p2272_p6), %s1556_s22, 256  }
 0x1d5   : > { %2505 = vsyncadd (!%p2272_p6), %s1556_s22, 4294967040  ;;  %s26_s17 = sadd.s32 1, %s2528_s17   ;;  %s3104_s12 = smov %s2512_s13 }
 0x1d6   : > { %p23_p2 = scmp.ge.s32.totalorder %s26_s17, 4   ;;  %s3105_s13 = smov %s2516_s14 }
 0x1d7   : > { %s3106_s14 = smov %s2616_s26  ;;  %s3107_s15 = smov %s2524_s16 }
 0x1d8   : > { %s3108_s16 = smov %s3110_s20  ;;  %25 = sbr.rel (!%p23_p2) target bundleno = 10 (0xa), region = 112 }
 0x1df   :  { %1561 = vsyncpa [#allocation5], 1 }
 0x1e0   :  { %1563 = vsyncpa [#allocation5 + $0x1], 1 }
 0x1e1   :  { %1564 = vsyncpa [#allocation8], 1 }
 0x1e2   :  { %1566 = vsyncpa [#allocation8 + $0x1], 1 }
 0x1e3   :  { %1567 = vsyncpa [#allocation6], 1 }
 0x1e4   :  { %1569 = vsyncpa [#allocation6 + $0x1], 1 }
 0x1e5   :  { %1570 = vsyncpa [#allocation11], 1 }
 0x1e6   :  { %1572 = vsyncpa [#allocation11 + $0x1], 1 }

</bundles_post_ra>
